<compile_context>
chip_gen: v7x
topology: tpu7x:2x2x1
jax: 0.10.0
libtpu: 0.0.40
codegen_flags: <defaults>
</compile_context>

<pallas_src>
import functools

import jax
import jax.numpy as jnp
from jax.experimental import pallas as pl
from jax.experimental.pallas import tpu as pltpu


def _conbnact_kernel(x_ref, w_ref, scale_ref, bias_ref, o_ref, *, act):
    # x_ref:     (1, Cin, tHW)   bf16
    # w_ref:     (tCout, Cin)    bf16
    # scale/bias:(tCout, 1)      f32
    # o_ref:     (1, tCout, tHW) f32
    y = jnp.dot(w_ref[...], x_ref[0],
                preferred_element_type=jnp.float32)            # (tCout, tHW)
    y = y * scale_ref[...] + bias_ref[...]                     # fused BN (f32)

    if act in ("Relu", "R"):
        y = jnp.maximum(y, 0.0)
    elif act in ("Hardswish", "H"):
        y = y * jnp.clip(y + 3.0, 0.0, 6.0) * (1.0 / 6.0)
    elif act in ("Tanh", "T"):
        y = jnp.tanh(y)
    # 'Linear' / 'L': identity

    o_ref[0] = y.astype(o_ref.dtype)


def _plan_tiles(hw, cin, cout, n, *, x_bytes, o_bytes=4,
                vmem_budget=48 << 20, max_hw_tile=2048, max_cout_tile=512):
    """Pick (tCout, tHW) from a VMEM budget. Tails are handled via cdiv."""
    tcout = cout if cout <= max_cout_tile else max_cout_tile   # 512 is 8-aligned

    if hw <= 256:
        thw = hw                                               # full lane extent
    else:
        # Double-buffered x and out tiles grow with tHW; weights are resident.
        per_col = 2 * (cin * x_bytes + tcout * o_bytes)
        fixed = 2 * tcout * cin * x_bytes + 4 * tcout * 2
        avail = max(vmem_budget - fixed, 256 * per_col)
        thw = int(min(max_hw_tile, avail // per_col))
        thw = max(256, (thw // 256) * 256)                     # MXU/lane friendly
        thw = min(thw, pl.cdiv(hw, 256) * 256)                 # no useless padding

    # v7x megacore: make sure both TensorCores get at least one grid step.
    while (n * pl.cdiv(cout, tcout) * pl.cdiv(hw, thw) < 2
           and thw >= 256 and (thw // 2) % 128 == 0):
        thw //= 2

    return tcout, thw


def con_bn_act(x, w, gamma, beta, running_mean, running_var, *,
               eps=1e-3, act="Linear", compute_dtype=jnp.bfloat16):
    """x: (N, Cin, H, W) f32; w: (Cout, Cin) 1x1-conv weight (spatial squeezed)."""
    N, Cin, H, W = x.shape
    Cout = w.shape[0]
    HW = H * W

    # Native NCHW -> (N, Cin, HW): a free reshape, no HBM transpose pass.
    x_l = x.reshape(N, Cin, HW).astype(compute_dtype)
    w_c = w.astype(compute_dtype)                              # (Cout, Cin)

    scale = (gamma / jnp.sqrt(running_var + eps)).astype(jnp.float32)
    bias = (beta - running_mean * scale).astype(jnp.float32)
    scale = scale.reshape(Cout, 1)
    bias = bias.reshape(Cout, 1)

    x_bytes = jnp.dtype(compute_dtype).itemsize
    tcout, thw = _plan_tiles(HW, Cin, Cout, N, x_bytes=x_bytes)
    grid = (N, pl.cdiv(Cout, tcout), pl.cdiv(HW, thw))

    # Explicit VMEM budget: double-buffered in/out tiles + resident weights,
    # capped at 48 MiB to leave headroom on v7x's 64 MiB per-TC VMEM.
    needed = (2 * thw * (Cin * x_bytes + tcout * 4)
              + 2 * tcout * Cin * x_bytes + 8 * tcout)
    vmem_limit = int(min(48 << 20, max(needed + (4 << 20), 16 << 20)))

    kernel = functools.partial(_conbnact_kernel, act=act)

    out_l = pl.pallas_call(
        kernel,
        out_shape=jax.ShapeDtypeStruct((N, Cout, HW), jnp.float32),
        grid_spec=pltpu.PrefetchScalarGridSpec(
            num_scalar_prefetch=0,
            grid=grid,
            in_specs=[
                pl.BlockSpec((1, Cin, thw), lambda n, c, h: (n, 0, h)),   # x tile
                pl.BlockSpec((tcout, Cin), lambda n, c, h: (c, 0)),       # weights
                pl.BlockSpec((tcout, 1), lambda n, c, h: (c, 0)),         # BN scale
                pl.BlockSpec((tcout, 1), lambda n, c, h: (c, 0)),         # BN bias
            ],
            out_specs=pl.BlockSpec((1, tcout, thw), lambda n, c, h: (n, c, h)),
        ),
        compiler_params=pltpu.CompilerParams(
            dimension_semantics=("parallel", "parallel", "parallel"),
            vmem_limit_bytes=vmem_limit),
    )(x_l, w_c, scale, bias)

    return out_l.reshape(N, Cout, H, W)


def _init_params(key, in_channels, out_channels):
    k1, k2, k3, k4, k5 = jax.random.split(key, 5)
    bound = 1.0 / jnp.sqrt(in_channels)          # fan_in of 1x1 conv
    w = jax.random.uniform(k1, (out_channels, in_channels), jnp.float32,
                           -bound, bound)
    gamma = jax.random.uniform(k2, (out_channels,), jnp.float32, 0.5, 1.5)
    beta = 0.1 * jax.random.normal(k3, (out_channels,), jnp.float32)
    mean = 0.1 * jax.random.normal(k4, (out_channels,), jnp.float32)
    var = jax.random.uniform(k5, (out_channels,), jnp.float32, 0.5, 1.5)
    return w, gamma, beta, mean, var


def _reference(x, w, gamma, beta, mean, var, eps, act, compute_dtype=jnp.bfloat16):
    # Pure-JAX reference (eval-mode BN folded in), mirroring the kernel's
    # bf16 input cast with f32 accumulation.
    N, Cin, H, W = x.shape
    Cout = w.shape[0]
    xm = x.astype(compute_dtype).astype(jnp.float32).reshape(N, Cin, H * W)
    wm = w.astype(compute_dtype).astype(jnp.float32)
    y = jnp.einsum("oc,nch->noh", wm, xm,
                   preferred_element_type=jnp.float32)         # (N, Cout, HW)
    s = gamma / jnp.sqrt(var + eps)
    y = y * s[None, :, None] + (beta - mean * s)[None, :, None]
    if act in ("Relu", "R"):
        y = jnp.maximum(y, 0.0)
    elif act in ("Hardswish", "H"):
        y = y * jnp.clip(y + 3.0, 0.0, 6.0) / 6.0
    elif act in ("Tanh", "T"):
        y = jnp.tanh(y)
    return y.reshape(N, Cout, H, W)


if __name__ == "__main__":
    key = jax.random.PRNGKey(0)

    # (N, Cin, Cout, H, W): second case exercises the HW tail (HW=400, thw=256).
    cases = [(2, 4, 8, 16, 16), (1, 4, 8, 20, 20)]

    for N, CIN, COUT, H, W in cases:
        kx, kp = jax.random.split(jax.random.fold_in(key, N * H), 2)
        x = jax.random.normal(kx, (N, CIN, H, W), jnp.float32)
        w, gamma, beta, mean, var = _init_params(kp, CIN, COUT)

        for act in ("Linear", "Relu", "Hardswish", "Tanh"):
            out = con_bn_act(x, w, gamma, beta, mean, var, eps=1e-3, act=act)
            out = jax.block_until_ready(out)
            ref = _reference(x, w, gamma, beta, mean, var, 1e-3, act)
            assert out.shape == (N, COUT, H, W)
            assert jnp.allclose(out, ref, atol=5e-4, rtol=5e-4), (
                f"mismatch for act={act}, shape={(N, CIN, COUT, H, W)}")

    print("KERNEL_OK")
</pallas_src>

<mosaic_0001>
module attributes {stable_mosaic.version = 11 : i64} {
  func.func @_conbnact_kernel(%arg0: i32, %arg1: i32, %arg2: i32, %arg3: memref<1x4x256xbf16, #tpu.memory_space<vmem>>, %arg4: memref<8x4xbf16, #tpu.memory_space<vmem>>, %arg5: memref<8x1xf32, #tpu.memory_space<vmem>>, %arg6: memref<8x1xf32, #tpu.memory_space<vmem>>, %arg7: memref<1x8x256xf32, #tpu.memory_space<vmem>>) attributes {dimension_semantics = [#tpu.dimension_semantics<parallel>, #tpu.dimension_semantics<parallel>, #tpu.dimension_semantics<parallel>], iteration_bounds = array<i64: 2, 1, 1>, scalar_prefetch = 0 : i64, scratch_operands = 0 : i64, tpu.core_type = #tpu.core_type<tc>, window_params = [{transform_indices = @transform_0, window_bounds = array<i64: 1, 4, 256>}, {transform_indices = @transform_1, window_bounds = array<i64: 8, 4>}, {transform_indices = @transform_2, window_bounds = array<i64: 8, 1>}, {transform_indices = @transform_3, window_bounds = array<i64: 8, 1>}, {transform_indices = @transform_4, window_bounds = array<i64: 1, 8, 256>}]} {
    %c0 = arith.constant 0 : index
    %c0_0 = arith.constant 0 : index
    %0 = vector.load %arg4[%c0, %c0_0] : memref<8x4xbf16, #tpu.memory_space<vmem>>, vector<8x4xbf16>
    %c0_1 = arith.constant 0 : index
    %c0_2 = arith.constant 0 : index
    %c0_3 = arith.constant 0 : index
    %1 = vector.load %arg3[%c0_1, %c0_2, %c0_3] : memref<1x4x256xbf16, #tpu.memory_space<vmem>>, vector<1x4x256xbf16>
    %2 = vector.shape_cast %1 : vector<1x4x256xbf16> to vector<4x256xbf16>
    %cst = arith.constant dense<0.000000e+00> : vector<8x256xf32>
    %3 = tpu.matmul %0, %2, %cst {dimension_numbers = #tpu.dot_dimension_numbers<[1], [0], [0], [1], [0, 0, 1, 1], [], []>} : vector<8x4xbf16>, vector<4x256xbf16>, vector<8x256xf32> -> vector<8x256xf32>
    %c0_4 = arith.constant 0 : index
    %c0_5 = arith.constant 0 : index
    %4 = vector.load %arg5[%c0_4, %c0_5] : memref<8x1xf32, #tpu.memory_space<vmem>>, vector<8x1xf32>
    %5 = vector.broadcast %4 : vector<8x1xf32> to vector<8x256xf32>
    %6 = arith.mulf %3, %5 : vector<8x256xf32>
    %c0_6 = arith.constant 0 : index
    %c0_7 = arith.constant 0 : index
    %7 = vector.load %arg6[%c0_6, %c0_7] : memref<8x1xf32, #tpu.memory_space<vmem>>, vector<8x1xf32>
    %8 = vector.broadcast %7 : vector<8x1xf32> to vector<8x256xf32>
    %9 = arith.addf %6, %8 : vector<8x256xf32>
    %c0_8 = arith.constant 0 : index
    %c0_9 = arith.constant 0 : index
    %c0_10 = arith.constant 0 : index
    %10 = vector.load %arg7[%c0_8, %c0_9, %c0_10] : memref<1x8x256xf32, #tpu.memory_space<vmem>>, vector<1x8x256xf32>
    %11 = vector.shape_cast %10 : vector<1x8x256xf32> to vector<8x256xf32>
    %12 = vector.shape_cast %9 : vector<8x256xf32> to vector<1x8x256xf32>
    tpu.vector_store %arg7[%c0_8, %c0_9, %c0_10], %12 {strides = array<i32>} : memref<1x8x256xf32, #tpu.memory_space<vmem>>, vector<1x8x256xf32>,
    return
  }
  func.func @transform_0(%arg0: i32, %arg1: i32, %arg2: i32) -> (i32, i32, i32) {
    %c0_i32 = arith.constant 0 : i32
    %c0_i32_0 = arith.constant 0 : i32
    return %arg0, %c0_i32, %arg2 : i32, i32, i32
  }
  func.func @transform_1(%arg0: i32, %arg1: i32, %arg2: i32) -> (i32, i32) {
    %c0_i32 = arith.constant 0 : i32
    %c0_i32_0 = arith.constant 0 : i32
    return %arg1, %c0_i32 : i32, i32
  }
  func.func @transform_2(%arg0: i32, %arg1: i32, %arg2: i32) -> (i32, i32) {
    %c0_i32 = arith.constant 0 : i32
    %c0_i32_0 = arith.constant 0 : i32
    return %arg1, %c0_i32 : i32, i32
  }
  func.func @transform_3(%arg0: i32, %arg1: i32, %arg2: i32) -> (i32, i32) {
    %c0_i32 = arith.constant 0 : i32
    %c0_i32_0 = arith.constant 0 : i32
    return %arg1, %c0_i32 : i32, i32
  }
  func.func @transform_4(%arg0: i32, %arg1: i32, %arg2: i32) -> (i32, i32, i32) {
    %c0_i32 = arith.constant 0 : i32
    return %arg0, %arg1, %arg2 : i32, i32, i32
  }
}

</mosaic_0001>

<bundles_post_ra>
// kernel: tpu_custom_call.1
= control target key start
LH: loop header
LB: loop body
LE: loop exit
PB: predicated region body
PF: predicated region fallthrough
CT: control target
= control target key end

     0   :  { %9 = vsyncpa [#allocation3], 0  ;;  %s820_s0 = inlined_call_operand.vmem [shape: bf16[2,4,256], index: 0, kind: input, shape index: {}]   ;;  %s821_s1 = inlined_call_operand.vmem [shape: bf16[8,4], index: 1, kind: input, shape index: {}]   ;;  %s822_s2 = inlined_call_operand.vmem [shape: f32[8,1], index: 2, kind: input, shape index: {}]   ;;  %s823_s3 = inlined_call_operand.vmem [shape: f32[8,1], index: 3, kind: input, shape index: {}]   ;;  %s824_s4 = inlined_call_operand.hbm [shape: f32[2,8,256], index: 4, kind: output, shape index: {}]  }
   0x1   :  { %11 = vsyncpa [#allocation3 + $0x1], 0  ;;  %s699_s15 = smov 0   ;;  %s701_s16 = smov 0  }
   0x2   :  { %s703_s17 = smov 0   ;;  %s705_s18 = smov 0  }
   0x3   :  { %s707_s19 = smov 0   ;;  %s709_s20 = smov 0  }
   0x4 LB: > { %s514_s21 = sadd.s32 4294967295, %s670_s20   ;;  %s515_s22 = sadd.s32 4294967294, %s670_s20   ;;  %s670_s20 = sphi %s709_s20, %s17_s20   ;;  %s666_s19 = sphi %s707_s19, %s831_s19   ;;  %s662_s18 = sphi %s705_s18, %s830_s18   ;;  %s658_s17 = sphi %s703_s17, %s829_s17   ;;  %s654_s16 = sphi %s701_s16, %s828_s16   ;;  %s650_s15 = sphi %s699_s15, %s827_s15  }
   0x5   : > { %s36_s23 = sadd.s32 1, %s666_s19  ;;  %s153_s24 = sadd.s32 1, %s658_s17 }
   0x6   : > { %p38_p0 = scmp.ge.s32.totalorder %s36_s23, 2  ;;  %p163_p1 = scmp.ne.s32.totalorder %s658_s17, %s654_s16 }
   0x7   : > { %p164_p2 = scmp.eq.s32.totalorder %s514_s21, 1  ;;  %p169_p3 = scmp.ne.s32.totalorder %s654_s16, %s650_s15 }
   0x8   : > { %s833_s23 = smov (%p38_p0, %s36_s23), 0  ;;  %p170_p5 = scmp.eq.s32.totalorder %s515_s22, 1 }
   0x9   : > { %p739_p4 = por %p164_p2, %p163_p1  ;;  %s146_s26 = ssub.s32 %s666_s19, %s833_s23 }
   0xa   : > { %p521_p6 = scmp.ge.s32.totalorder %s670_s20, 1  ;;  %p151_p7 = scmp.eq.s32.totalorder %s146_s26, 0 }
   0xb   : > { %p746_p8 = por %p170_p5, %p169_p3  ;;  %p222_p9 = scmp.lt.s32.totalorder %s670_s20, 3 }
   0xc   : > { %s752_s28 = scalar_select %p151_p7, %s658_s17, %s153_s24  }
   0xd   : > { %p223_p10 = pnand %p521_p6, %p222_p9 }
   0xe   : > { %p265_p11 = scmp.lt.s32.totalorder (!%p223_p10), %s662_s18, 1  ;;  %v672_v0 = vmov (!%p223_p10), 0   ;;  %v351_v1 = vld [vmem:[%s822_s2] sm:$0xff] (!%p223_p10)  ;;  %vm303_vm0 = vcmask (!%p223_p10), 1041408   ;;  %vm299_vm1 = vcmask (!%p223_p10), 31744   ;;  %s261_s14 = sand.u32 (!%p223_p10), 1, %s654_s16  }
   0xf   : > { %226 = sbr.rel (%p223_p10) target bundleno = 264 (0x108), region = 36  ;;  %342 = vmatprep.mubr.bf16.mxu0 (!%p223_p10), %v672_v0  ;;  %591 = vset.pattern.permute.xlu0 (!%p223_p10), %v672_v0  ;;  %v359_v2 = vld [vmem:[%s823_s3] sm:$0xff] (!%p223_p10)  ;;  %s522_s21 = sshll.u32 (!%p223_p10), %s261_s14, 4 }
  0x10   : > { %354 = vperm.xlu0 (!%p223_p10), %591, %v351_v1   ;;  %v288_v6 = vld [vmem:[%s821_s1] sm:$0xf] (!%p223_p10)  ;;  %s534_s22 = sshll.u32 (!%p223_p10), %s662_s18, 8  ;;  %s263_s24 = scalar_lea.vmem (!%p223_p10), [#allocation2], %s522_s21 }
  0x11   : > { %s388_s26 = sshll.u32 (!%p223_p10), %s263_s24, 4  ;;  %s673_s7 = smov (!%p223_p10), [#allocation2]   ;;  %s775_s26 = int_to_ptr.vmem [resolvable:$true] %s388_s26 }
  0x12   : > { %s592_s6 = scalar_lea.vmem (!%p223_p10), %s775_s26, 256 }
  0x13   : > { %p593_p12 = scmp.ne.s32.totalorder (!%p223_p10), %s775_s26, %s592_s6 }
  0x14   : > { %362 = vperm.xlu0 (!%p223_p10), %591, %v359_v2  }
  0x15   : > { %p594_p13 = pnand (!%p223_p10), %p593_p12, %p739_p4 }
  0x16   : > { %s266_s5 = scalar_select %p265_p11, %s662_s18, 1 }
  0x17   : > { %s370_s18 = scalar_lea.sflag [#allocation3], %s261_s14  ;;  %p595_p0 = pneg %p594_p13 }
  0x18   : > { %s533_s8 = sshll.u32 %s266_s5, 2  ;;  %s773_s5 = scalar_lea.hbm %s824_s4, %s534_s22 }
  0x19   : > { %s272_s11 = scalar_lea.vmem %s820_s0, %s533_s8  ;;  %s596_s8 = sshll.u32 %s673_s7, 4  ;;  %s597_s8 = int_to_ptr.vmem [resolvable:$false] %s596_s8 }
  0x1a   : > { %v525_v3 = vld.sshfl [vmem:[%s272_s11] sm:$0x33 pattern:$0x76325410]  ;;  %s598_s9 = scalar_lea.vmem %s597_s8, 512  ;;  %p599_p1 = scmp.lt.s32.totalorder %s775_s26, %s597_s8 }
  0x1b   : > { %v298_v4 = vcombine.high %v525_v3, %v525_v3  ;;  %v305_v5 = vsel %vm303_vm0, %v525_v3, 0  ;;  %p600_p2 = scmp.lt.s32.totalorder %s598_s9, %s592_s6 }
  0x1d   : > { %526 = vmatprep.subr.msk.bf16.mxu0 %vm303_vm0, %v298_v4  ;;  %p601_p3 = por %p600_p2, %p599_p1 }
  0x1e   : > { %311 = vmatpush1.bf16.msra.mxu0 %v305_v5 }
  0x1f   : > { %p602_p5 = pnand %p601_p3, %p595_p0 }
  0x21   : > { %527 = vmatmul.mubr.msk.bf16.vlgmr.msra.gmra.mrb[0].mxu0 %vm299_vm1, %v288_v6 }
  0x8f   : > { %v355_v7 = vpop.permute.xlu0 %354 }
  0x93   : > { %v363_v11 = vpop.permute.xlu0 %362 }
  0xf4   : > { %v344_v8 = vpop.f32.mrb[0].mxu0 }
  0xf5   : > { %v357_v9 = vmul.f32 %v355_v7, %v344_v8  ;;  %v346_v10 = vpop.f32.mrb[1].mxu0 }
  0xf6   : > { %v358_v12 = vmul.f32 %v355_v7, %v346_v10  ;;  %v348_v13 = vpop.f32.mrb[2].mxu0 }
  0xf7   : > { %v365_v14 = vadd.f32 %v363_v11, %v357_v9  ;;  %v349_v15 = vpop.f32.mrb[3].mxu0 }
  0xf8   : > { %v366_v16 = vadd.f32 %v363_v11, %v358_v12 }
  0xf9   : > { %367 = vst [vmem:[%s263_s24] sm:$0xff] %v365_v14 }
  0xfa   : > { %368 = vst [vmem:[%s263_s24 + $0x8] sm:$0xff] %v366_v16 }
  0xfb   : > { %605 = shalt.err (!%p602_p5)
}
  0xfc   : > { %s606_s10 = scalar_lea.hbm %s773_s5, 256  ;;  %s610_s13 = scalar_lea.hbm %s824_s4, 512 }
  0xfd   : > { %p607_p6 = scmp.ne.s32.totalorder %s773_s5, %s606_s10  ;;  %p611_p10 = scmp.lt.u32.totalorder %s773_s5, %s824_s4 }
  0xfe   : > { %p612_p11 = scmp.lt.u32.totalorder %s610_s13, %s606_s10  ;;  %p614_p13 = scmp.lt.u32.totalorder %s606_s10, %s773_s5 }
  0xff   : > { %p608_p7 = pnand %p607_p6, %p739_p4 }
 0x100   : > { %p613_p12 = por %p612_p11, %p611_p10 }
 0x101   : > { %p609_p9 = pneg %p608_p7 }
 0x102   : > { %p615_p0 = por %p614_p13, %p613_p12 }
 0x104   : > { %p616_p1 = pnand %p615_p0, %p609_p9 }
 0x106   : > { %619 = shalt.err (!%p616_p1)
}
 0x107   : > { %535 = dma.vmem_to_hbm [thread:$0]  (%p739_p4), %s775_s26, 256, %s773_s5, %s370_s18  }
 0x108 PF: > { %p541_p2 = scmp.ge.s32.totalorder %s670_s20, 2  ;;  %s400_s22 = sand.u32 1, %s650_s15  }
 0x109   : > { %s401_s24 = scalar_lea.sflag [#allocation3], %s400_s22 }
 0x10a   : > { %p538_p3 = pnand %p541_p2, %p746_p8 }
 0x10c   : > { %645 = dma.done.wait (!%p538_p3), %s401_s24, 256  }
 0x10d   : > { %647 = vsyncadd (!%p538_p3), %s401_s24, 4294967040  ;;  %s17_s20 = sadd.s32 1, %s670_s20   ;;  %s827_s15 = smov %s654_s16 }
 0x10e   : > { %p14_p5 = scmp.ge.s32.totalorder %s17_s20, 4   ;;  %s828_s16 = smov %s658_s17 }
 0x10f   : > { %s829_s17 = smov %s752_s28  ;;  %s830_s18 = smov %s666_s19 }
 0x110   : > { %s831_s19 = smov %s833_s23  ;;  %16 = sbr.rel (!%p14_p5) target bundleno = 4 (0x4), region = 80 }
 0x117   :  { %406 = vsyncpa [#allocation3], 1 }
 0x118   :  { %408 = vsyncpa [#allocation3 + $0x1], 1 }

</bundles_post_ra>
